<compile_context>
chip_gen: v7x
topology: tpu7x:2x2x1
jax: 0.10.0
libtpu: 0.0.40
codegen_flags: <defaults>
</compile_context>

<pallas_src>
import functools

import jax
import jax.numpy as jnp
from jax.experimental import pallas as pl
from jax.experimental.pallas import tpu as pltpu

EPS = 1e-5  # PyTorch InstanceNorm2d default eps


# ---------------------------------------------------------------------------
# Fused per-block kernel: out = x + IN2(conv2(relu(IN1(conv1(x)))))
# Layout: channels on sublanes, flattened H*W on lanes.
# ---------------------------------------------------------------------------
def _resblock_kernel(x_ref, w1_ref, w2_ref, aff_ref, mask_ref, o_ref,
                     h_ref, p_ref, *, H, W, nb):
    HW = H * W
    inv_hw = 1.0 / HW
    Cout = h_ref.shape[0]

    def build_patch(inp):
        # inp: (Cin, HW) f32.  Writes the stacked 9-tap patch (9*Cin, HW) into p_ref
        # (MXU dtype), tap-major so rows match the host-flattened (Cout, 9*Cin) weights.
        cin = inp.shape[0]
        for t in range(9):
            dh, dw = t // 3 - 1, t % 3 - 1
            s = dh * W + dw                      # flattened-HW shift of this tap
            shifted = inp if s == 0 else pltpu.roll(inp, shift=(-s) % HW, axis=1)
            if t != 4:                           # center tap never crosses the border
                shifted = shifted * mask_ref[t:t + 1, :]   # zero the zero-pad taps
            p_ref[t * cin:(t + 1) * cin, :] = shifted.astype(p_ref.dtype)

    def instance_norm(y, g, b):
        # Single-pass per-channel stats over the lane axis; biased variance (PyTorch IN).
        s = jnp.sum(y, axis=1, keepdims=True)
        ss = jnp.sum(y * y, axis=1, keepdims=True)
        mean = s * inv_hw
        var = jnp.maximum(ss * inv_hw - mean * mean, 0.0)   # clamp tiny cancellation
        inv = jax.lax.rsqrt(var + EPS)                       # EUP
        scale = inv * g
        shift = b - mean * scale
        return y * scale + shift                             # 2 full-tile VPU ops

    for i in range(nb):
        # conv1 -> IN1 -> ReLU   (single 9*Cin-deep MXU matmul, f32 accumulate)
        build_patch(x_ref[i])
        y1 = jnp.dot(w1_ref[...], p_ref[...], preferred_element_type=jnp.float32)
        h_ref[...] = jnp.maximum(
            instance_norm(y1, aff_ref[:, 0:1], aff_ref[:, 1:2]), 0.0)

        # conv2 -> IN2
        build_patch(h_ref[...])
        y2 = jnp.dot(w2_ref[...], p_ref[...], preferred_element_type=jnp.float32)
        y2 = instance_norm(y2, aff_ref[:, 2:3], aff_ref[:, 3:4])

        # residual add: re-read x from the still-resident input VMEM block
        o_ref[i] = x_ref[i] + y2


# ---------------------------------------------------------------------------
# Wrapper: free layout prep (no im2col) + pallas_call
# ---------------------------------------------------------------------------
def _vmem_budget_bytes():
    cap = None
    try:
        cap = getattr(pltpu.get_tpu_info(), "vmem_capacity_bytes", None)
    except Exception:
        cap = None
    if not cap:
        cap = 64 * 1024 * 1024            # conservative fallback (v7x per-TC VMEM)
    return int(0.85 * int(cap))           # ~15% headroom for Mosaic-internal scratch


def residual_block_forward(x_nchw, params, *, samples_per_block=1,
                           mxu_dtype=jnp.bfloat16):
    """x + main(x), main = Conv3x3 -> IN(affine) -> ReLU -> Conv3x3 -> IN(affine)."""
    w1, g1, b1, w2, g2, b2 = params
    N, C, H, W = x_nchw.shape
    Cout = w1.shape[0]
    assert Cout == C, "residual add requires dim_in == dim_out"
    HW = H * W
    nb = samples_per_block
    assert N % nb == 0

    # NCHW -> (N, C, H*W): channels on sublanes, flattened spatial on lanes (free reshape).
    x = x_nchw.reshape(N, C, HW).astype(jnp.float32)

    # Conv weights (Cout, Cin, 3, 3) -> (Cout, 3, 3, Cin) -> (Cout, 9*Cin):
    # tap-major / channel-minor contraction order matching the in-kernel patch scratch.
    w1f = jnp.transpose(w1.astype(jnp.float32), (0, 2, 3, 1)).reshape(Cout, 9 * C)
    w2f = jnp.transpose(w2.astype(jnp.float32), (0, 2, 3, 1)).reshape(Cout, 9 * Cout)
    w1f = w1f.astype(mxu_dtype)
    w2f = w2f.astype(mxu_dtype)

    # Both INs' gamma/beta merged into one (Cout, 4) input: [g1, b1, g2, b2].
    aff = jnp.stack([g1, b1, g2, b2], axis=1).astype(jnp.float32)

    # 3x3 zero-pad boundary masks, one f32 row per tap, built once host-side.
    pos = jnp.arange(HW, dtype=jnp.int32)
    hh, ww = pos // W, pos % W
    rows = []
    for t in range(9):
        dh, dw = t // 3 - 1, t % 3 - 1
        rows.append((hh + dh >= 0) & (hh + dh < H) & (ww + dw >= 0) & (ww + dw < W))
    masks = jnp.stack(rows).astype(jnp.float32)          # (9, HW)

    # VMEM request: double-buffered in/out blocks + resident weights/masks + scratch.
    isz = jnp.dtype(mxu_dtype).itemsize
    block_bytes = 2 * 4 * nb * HW * (C + Cout)
    weight_bytes = 2 * (isz * 9 * Cout * (C + Cout) + 4 * 4 * Cout + 4 * 9 * HW)
    scratch_bytes = 4 * Cout * HW + isz * 9 * C * HW
    need = block_bytes + weight_bytes + scratch_bytes + (2 << 20)
    vmem_limit = max(min(max(need, 32 * 1024 * 1024), _vmem_budget_bytes()), 1 << 20)

    out = pl.pallas_call(
        functools.partial(_resblock_kernel, H=H, W=W, nb=nb),
        out_shape=jax.ShapeDtypeStruct((N, Cout, HW), jnp.float32),
        grid=(N // nb,),
        in_specs=[
            pl.BlockSpec((nb, C, HW), lambda n: (n, 0, 0)),
            pl.BlockSpec((Cout, 9 * C), lambda n: (0, 0)),
            pl.BlockSpec((Cout, 9 * Cout), lambda n: (0, 0)),
            pl.BlockSpec((Cout, 4), lambda n: (0, 0)),
            pl.BlockSpec((9, HW), lambda n: (0, 0)),
        ],
        out_specs=pl.BlockSpec((nb, Cout, HW), lambda n: (n, 0, 0)),
        scratch_shapes=[
            pltpu.VMEM((Cout, HW), jnp.float32),     # intermediate activation h
            pltpu.VMEM((9 * C, HW), mxu_dtype),      # stacked 9-tap patch (bf16)
        ],
        compiler_params=pltpu.CompilerParams(
            dimension_semantics=("parallel",),
            vmem_limit_bytes=int(vmem_limit),
        ),
    )(x, w1f, w2f, aff, masks)

    return out.reshape(N, Cout, H, W).astype(x_nchw.dtype)


# ---------------------------------------------------------------------------
# Pure-JAX reference (sanity check)
# ---------------------------------------------------------------------------
def _ref_forward(x, params):
    w1, g1, b1, w2, g2, b2 = params

    def conv(x, w):
        return jax.lax.conv_general_dilated(
            x, w, window_strides=(1, 1), padding=((1, 1), (1, 1)),
            dimension_numbers=("NCHW", "OIHW", "NCHW"))

    def inorm(x, g, b):
        m = jnp.mean(x, axis=(2, 3), keepdims=True)
        v = jnp.mean(jnp.square(x - m), axis=(2, 3), keepdims=True)
        xh = (x - m) / jnp.sqrt(v + EPS)
        return xh * g[None, :, None, None] + b[None, :, None, None]

    h = jax.nn.relu(inorm(conv(x, w1), g1, b1))
    return x + inorm(conv(h, w2), g2, b2)


if __name__ == "__main__":
    N, C, H, W = 2, 4, 16, 16          # batch=2, dim_in=dim_out=4 (residual needs equality)
    dim_in = dim_out = C

    key = jax.random.PRNGKey(0)
    ks = jax.random.split(key, 7)
    x = jax.random.normal(ks[0], (N, C, H, W), jnp.float32)
    w1 = 0.1 * jax.random.normal(ks[1], (dim_out, dim_in, 3, 3), jnp.float32)
    g1 = 1.0 + 0.1 * jax.random.normal(ks[2], (dim_out,), jnp.float32)
    b1 = 0.1 * jax.random.normal(ks[3], (dim_out,), jnp.float32)
    w2 = 0.1 * jax.random.normal(ks[4], (dim_out, dim_out, 3, 3), jnp.float32)
    g2 = 1.0 + 0.1 * jax.random.normal(ks[5], (dim_out,), jnp.float32)
    b2 = 0.1 * jax.random.normal(ks[6], (dim_out,), jnp.float32)
    params = (w1, g1, b1, w2, g2, b2)

    out = jax.jit(residual_block_forward)(x, params)
    out = jax.block_until_ready(out)
    assert out.shape == (N, C, H, W) and out.dtype == jnp.float32

    ref = jax.block_until_ready(_ref_forward(x, params))
    # bf16 MXU inputs (f32 accumulate / stats / residual): slightly looser tolerance.
    assert jnp.allclose(out, ref, rtol=5e-2, atol=5e-2), float(jnp.max(jnp.abs(out - ref)))

    print("KERNEL_OK")
</pallas_src>

<mosaic_0001>
module attributes {stable_mosaic.version = 11 : i64} {
  func.func @_resblock_kernel(%arg0: i32, %arg1: memref<1x4x256xf32, #tpu.memory_space<vmem>>, %arg2: memref<4x36xbf16, #tpu.memory_space<vmem>>, %arg3: memref<4x36xbf16, #tpu.memory_space<vmem>>, %arg4: memref<4x4xf32, #tpu.memory_space<vmem>>, %arg5: memref<9x256xf32, #tpu.memory_space<vmem>>, %arg6: memref<1x4x256xf32, #tpu.memory_space<vmem>>, %arg7: memref<4x256xf32, #tpu.memory_space<vmem>>, %arg8: memref<36x256xbf16, #tpu.memory_space<vmem>>) attributes {dimension_semantics = [#tpu.dimension_semantics<parallel>], iteration_bounds = array<i64: 2>, scalar_prefetch = 0 : i64, scratch_operands = 2 : i64, tpu.core_type = #tpu.core_type<tc>, window_params = [{transform_indices = @transform_0, window_bounds = array<i64: 1, 4, 256>}, {pipeline_mode = #tpu.pipeline_mode<synchronous>, transform_indices = @transform_1, window_bounds = array<i64: 4, 36>}, {pipeline_mode = #tpu.pipeline_mode<synchronous>, transform_indices = @transform_2, window_bounds = array<i64: 4, 36>}, {pipeline_mode = #tpu.pipeline_mode<synchronous>, transform_indices = @transform_3, window_bounds = array<i64: 4, 4>}, {pipeline_mode = #tpu.pipeline_mode<synchronous>, transform_indices = @transform_4, window_bounds = array<i64: 9, 256>}, {transform_indices = @transform_5, window_bounds = array<i64: 1, 4, 256>}]} {
    %c0 = arith.constant 0 : index
    %c0_0 = arith.constant 0 : index
    %c0_1 = arith.constant 0 : index
    %0 = vector.load %arg1[%c0, %c0_0, %c0_1] : memref<1x4x256xf32, #tpu.memory_space<vmem>>, vector<1x4x256xf32>
    %1 = vector.shape_cast %0 : vector<1x4x256xf32> to vector<4x256xf32>
    %c17_i32 = arith.constant 17 : i32
    %2 = tpu.dynamic_rotate %1 by %c17_i32 dim 1 : vector<4x256xf32>, i32 -> vector<4x256xf32>
    %c0_2 = arith.constant 0 : index
    %c0_3 = arith.constant 0 : index
    %3 = vector.load %arg5[%c0_2, %c0_3] : memref<9x256xf32, #tpu.memory_space<vmem>>, vector<1x256xf32>
    %4 = vector.broadcast %3 : vector<1x256xf32> to vector<4x256xf32>
    %5 = arith.mulf %2, %4 : vector<4x256xf32>
    %6 = arith.truncf %5 : vector<4x256xf32> to vector<4x256xbf16>
    %c0_4 = arith.constant 0 : index
    %c0_5 = arith.constant 0 : index
    %7 = vector.load %arg8[%c0_4, %c0_5] : memref<36x256xbf16, #tpu.memory_space<vmem>>, vector<4x256xbf16>
    tpu.vector_store %arg8[%c0_4, %c0_5], %6 {strides = array<i32>} : memref<36x256xbf16, #tpu.memory_space<vmem>>, vector<4x256xbf16>,
    %c16_i32 = arith.constant 16 : i32
    %8 = tpu.dynamic_rotate %1 by %c16_i32 dim 1 : vector<4x256xf32>, i32 -> vector<4x256xf32>
    %c1 = arith.constant 1 : index
    %c0_6 = arith.constant 0 : index
    %9 = vector.load %arg5[%c1, %c0_6] : memref<9x256xf32, #tpu.memory_space<vmem>>, vector<1x256xf32>
    %10 = vector.broadcast %9 : vector<1x256xf32> to vector<4x256xf32>
    %11 = arith.mulf %8, %10 : vector<4x256xf32>
    %12 = arith.truncf %11 : vector<4x256xf32> to vector<4x256xbf16>
    %c4 = arith.constant 4 : index
    %c0_7 = arith.constant 0 : index
    %13 = vector.load %arg8[%c4, %c0_7] : memref<36x256xbf16, #tpu.memory_space<vmem>>, vector<4x256xbf16>
    tpu.vector_store %arg8[%c4, %c0_7], %12 {strides = array<i32>} : memref<36x256xbf16, #tpu.memory_space<vmem>>, vector<4x256xbf16>,
    %c15_i32 = arith.constant 15 : i32
    %14 = tpu.dynamic_rotate %1 by %c15_i32 dim 1 : vector<4x256xf32>, i32 -> vector<4x256xf32>
    %c2 = arith.constant 2 : index
    %c0_8 = arith.constant 0 : index
    %15 = vector.load %arg5[%c2, %c0_8] : memref<9x256xf32, #tpu.memory_space<vmem>>, vector<1x256xf32>
    %16 = vector.broadcast %15 : vector<1x256xf32> to vector<4x256xf32>
    %17 = arith.mulf %14, %16 : vector<4x256xf32>
    %18 = arith.truncf %17 : vector<4x256xf32> to vector<4x256xbf16>
    %c8 = arith.constant 8 : index
    %c0_9 = arith.constant 0 : index
    %19 = vector.load %arg8[%c8, %c0_9] : memref<36x256xbf16, #tpu.memory_space<vmem>>, vector<4x256xbf16>
    tpu.vector_store %arg8[%c8, %c0_9], %18 {strides = array<i32>} : memref<36x256xbf16, #tpu.memory_space<vmem>>, vector<4x256xbf16>,
    %c1_i32 = arith.constant 1 : i32
    %20 = tpu.dynamic_rotate %1 by %c1_i32 dim 1 : vector<4x256xf32>, i32 -> vector<4x256xf32>
    %c3 = arith.constant 3 : index
    %c0_10 = arith.constant 0 : index
    %21 = vector.load %arg5[%c3, %c0_10] : memref<9x256xf32, #tpu.memory_space<vmem>>, vector<1x256xf32>
    %22 = vector.broadcast %21 : vector<1x256xf32> to vector<4x256xf32>
    %23 = arith.mulf %20, %22 : vector<4x256xf32>
    %24 = arith.truncf %23 : vector<4x256xf32> to vector<4x256xbf16>
    %c12 = arith.constant 12 : index
    %c0_11 = arith.constant 0 : index
    %25 = vector.load %arg8[%c12, %c0_11] : memref<36x256xbf16, #tpu.memory_space<vmem>>, vector<4x256xbf16>
    tpu.vector_store %arg8[%c12, %c0_11], %24 {strides = array<i32>} : memref<36x256xbf16, #tpu.memory_space<vmem>>, vector<4x256xbf16>,
    %26 = arith.truncf %1 : vector<4x256xf32> to vector<4x256xbf16>
    %c16 = arith.constant 16 : index
    %c0_12 = arith.constant 0 : index
    %27 = vector.load %arg8[%c16, %c0_12] : memref<36x256xbf16, #tpu.memory_space<vmem>>, vector<4x256xbf16>
    tpu.vector_store %arg8[%c16, %c0_12], %26 {strides = array<i32>} : memref<36x256xbf16, #tpu.memory_space<vmem>>, vector<4x256xbf16>,
    %c255_i32 = arith.constant 255 : i32
    %28 = tpu.dynamic_rotate %1 by %c255_i32 dim 1 : vector<4x256xf32>, i32 -> vector<4x256xf32>
    %c5 = arith.constant 5 : index
    %c0_13 = arith.constant 0 : index
    %29 = vector.load %arg5[%c5, %c0_13] : memref<9x256xf32, #tpu.memory_space<vmem>>, vector<1x256xf32>
    %30 = vector.broadcast %29 : vector<1x256xf32> to vector<4x256xf32>
    %31 = arith.mulf %28, %30 : vector<4x256xf32>
    %32 = arith.truncf %31 : vector<4x256xf32> to vector<4x256xbf16>
    %c20 = arith.constant 20 : index
    %c0_14 = arith.constant 0 : index
    %33 = vector.load %arg8[%c20, %c0_14] : memref<36x256xbf16, #tpu.memory_space<vmem>>, vector<4x256xbf16>
    tpu.vector_store %arg8[%c20, %c0_14], %32 {strides = array<i32>} : memref<36x256xbf16, #tpu.memory_space<vmem>>, vector<4x256xbf16>,
    %c241_i32 = arith.constant 241 : i32
    %34 = tpu.dynamic_rotate %1 by %c241_i32 dim 1 : vector<4x256xf32>, i32 -> vector<4x256xf32>
    %c6 = arith.constant 6 : index
    %c0_15 = arith.constant 0 : index
    %35 = vector.load %arg5[%c6, %c0_15] : memref<9x256xf32, #tpu.memory_space<vmem>>, vector<1x256xf32>
    %36 = vector.broadcast %35 : vector<1x256xf32> to vector<4x256xf32>
    %37 = arith.mulf %34, %36 : vector<4x256xf32>
    %38 = arith.truncf %37 : vector<4x256xf32> to vector<4x256xbf16>
    %c24 = arith.constant 24 : index
    %c0_16 = arith.constant 0 : index
    %39 = vector.load %arg8[%c24, %c0_16] : memref<36x256xbf16, #tpu.memory_space<vmem>>, vector<4x256xbf16>
    tpu.vector_store %arg8[%c24, %c0_16], %38 {strides = array<i32>} : memref<36x256xbf16, #tpu.memory_space<vmem>>, vector<4x256xbf16>,
    %c240_i32 = arith.constant 240 : i32
    %40 = tpu.dynamic_rotate %1 by %c240_i32 dim 1 : vector<4x256xf32>, i32 -> vector<4x256xf32>
    %c7 = arith.constant 7 : index
    %c0_17 = arith.constant 0 : index
    %41 = vector.load %arg5[%c7, %c0_17] : memref<9x256xf32, #tpu.memory_space<vmem>>, vector<1x256xf32>
    %42 = vector.broadcast %41 : vector<1x256xf32> to vector<4x256xf32>
    %43 = arith.mulf %40, %42 : vector<4x256xf32>
    %44 = arith.truncf %43 : vector<4x256xf32> to vector<4x256xbf16>
    %c28 = arith.constant 28 : index
    %c0_18 = arith.constant 0 : index
    %45 = vector.load %arg8[%c28, %c0_18] : memref<36x256xbf16, #tpu.memory_space<vmem>>, vector<4x256xbf16>
    tpu.vector_store %arg8[%c28, %c0_18], %44 {strides = array<i32>} : memref<36x256xbf16, #tpu.memory_space<vmem>>, vector<4x256xbf16>,
    %c239_i32 = arith.constant 239 : i32
    %46 = tpu.dynamic_rotate %1 by %c239_i32 dim 1 : vector<4x256xf32>, i32 -> vector<4x256xf32>
    %c8_19 = arith.constant 8 : index
    %c0_20 = arith.constant 0 : index
    %47 = vector.load %arg5[%c8_19, %c0_20] : memref<9x256xf32, #tpu.memory_space<vmem>>, vector<1x256xf32>
    %48 = vector.broadcast %47 : vector<1x256xf32> to vector<4x256xf32>
    %49 = arith.mulf %46, %48 : vector<4x256xf32>
    %50 = arith.truncf %49 : vector<4x256xf32> to vector<4x256xbf16>
    %c32 = arith.constant 32 : index
    %c0_21 = arith.constant 0 : index
    %51 = vector.load %arg8[%c32, %c0_21] : memref<36x256xbf16, #tpu.memory_space<vmem>>, vector<4x256xbf16>
    tpu.vector_store %arg8[%c32, %c0_21], %50 {strides = array<i32>} : memref<36x256xbf16, #tpu.memory_space<vmem>>, vector<4x256xbf16>,
    %c0_22 = arith.constant 0 : index
    %c0_23 = arith.constant 0 : index
    %52 = vector.load %arg2[%c0_22, %c0_23] : memref<4x36xbf16, #tpu.memory_space<vmem>>, vector<4x36xbf16>
    %c0_24 = arith.constant 0 : index
    %c0_25 = arith.constant 0 : index
    %53 = vector.load %arg8[%c0_24, %c0_25] : memref<36x256xbf16, #tpu.memory_space<vmem>>, vector<36x256xbf16>
    %cst = arith.constant dense<0.000000e+00> : vector<4x256xf32>
    %54 = tpu.matmul %52, %53, %cst {dimension_numbers = #tpu.dot_dimension_numbers<[1], [0], [0], [1], [0, 0, 1, 1], [], []>} : vector<4x36xbf16>, vector<36x256xbf16>, vector<4x256xf32> -> vector<4x256xf32>
    %c0_26 = arith.constant 0 : index
    %c0_27 = arith.constant 0 : index
    %55 = vector.load %arg4[%c0_26, %c0_27] : memref<4x4xf32, #tpu.memory_space<vmem>>, vector<4x1xf32>
    %c0_28 = arith.constant 0 : index
    %c1_29 = arith.constant 1 : index
    %56 = vector.load %arg4[%c0_28, %c1_29] : memref<4x4xf32, #tpu.memory_space<vmem>>, vector<4x1xf32>
    %cst_30 = arith.constant dense<0.000000e+00> : vector<4xf32>
    %57 = vector.multi_reduction <add>, %54, %cst_30 [1] : vector<4x256xf32> to vector<4xf32>
    %58 = vector.shape_cast %57 : vector<4xf32> to vector<4x1xf32>
    %59 = arith.mulf %54, %54 : vector<4x256xf32>
    %cst_31 = arith.constant dense<0.000000e+00> : vector<4xf32>
    %60 = vector.multi_reduction <add>, %59, %cst_31 [1] : vector<4x256xf32> to vector<4xf32>
    %61 = vector.shape_cast %60 : vector<4xf32> to vector<4x1xf32>
    %cst_32 = arith.constant 3.906250e-03 : f32
    %62 = vector.broadcast %cst_32 : f32 to vector<4x1xf32>
    %63 = arith.mulf %58, %62 : vector<4x1xf32>
    %cst_33 = arith.constant 3.906250e-03 : f32
    %64 = vector.broadcast %cst_33 : f32 to vector<4x1xf32>
    %65 = arith.mulf %61, %64 : vector<4x1xf32>
    %66 = arith.mulf %63, %63 : vector<4x1xf32>
    %67 = arith.subf %65, %66 : vector<4x1xf32>
    %cst_34 = arith.constant 0.000000e+00 : f32
    %68 = vector.broadcast %cst_34 : f32 to vector<4x1xf32>
    %69 = arith.maximumf %67, %68 : vector<4x1xf32>
    %cst_35 = arith.constant 9.99999974E-6 : f32
    %70 = vector.broadcast %cst_35 : f32 to vector<4x1xf32>
    %71 = arith.addf %69, %70 : vector<4x1xf32>
    %72 = math.rsqrt %71 : vector<4x1xf32>
    %73 = arith.mulf %72, %55 : vector<4x1xf32>
    %74 = arith.mulf %63, %73 : vector<4x1xf32>
    %75 = arith.subf %56, %74 : vector<4x1xf32>
    %76 = vector.broadcast %73 : vector<4x1xf32> to vector<4x256xf32>
    %77 = arith.mulf %54, %76 : vector<4x256xf32>
    %78 = vector.broadcast %75 : vector<4x1xf32> to vector<4x256xf32>
    %79 = arith.addf %77, %78 : vector<4x256xf32>
    %cst_36 = arith.constant 0.000000e+00 : f32
    %80 = vector.broadcast %cst_36 : f32 to vector<4x256xf32>
    %81 = arith.maximumf %79, %80 : vector<4x256xf32>
    %c0_37 = arith.constant 0 : index
    %c0_38 = arith.constant 0 : index
    %82 = vector.load %arg7[%c0_37, %c0_38] : memref<4x256xf32, #tpu.memory_space<vmem>>, vector<4x256xf32>
    tpu.vector_store %arg7[%c0_37, %c0_38], %81 {strides = array<i32>} : memref<4x256xf32, #tpu.memory_space<vmem>>, vector<4x256xf32>,
    %c0_39 = arith.constant 0 : index
    %c0_40 = arith.constant 0 : index
    %83 = vector.load %arg7[%c0_39, %c0_40] : memref<4x256xf32, #tpu.memory_space<vmem>>, vector<4x256xf32>
    %c17_i32_41 = arith.constant 17 : i32
    %84 = tpu.dynamic_rotate %83 by %c17_i32_41 dim 1 : vector<4x256xf32>, i32 -> vector<4x256xf32>
    %c0_42 = arith.constant 0 : index
    %c0_43 = arith.constant 0 : index
    %85 = vector.load %arg5[%c0_42, %c0_43] : memref<9x256xf32, #tpu.memory_space<vmem>>, vector<1x256xf32>
    %86 = vector.broadcast %85 : vector<1x256xf32> to vector<4x256xf32>
    %87 = arith.mulf %84, %86 : vector<4x256xf32>
    %88 = arith.truncf %87 : vector<4x256xf32> to vector<4x256xbf16>
    %c0_44 = arith.constant 0 : index
    %c0_45 = arith.constant 0 : index
    %89 = vector.load %arg8[%c0_44, %c0_45] : memref<36x256xbf16, #tpu.memory_space<vmem>>, vector<4x256xbf16>
    tpu.vector_store %arg8[%c0_44, %c0_45], %88 {strides = array<i32>} : memref<36x256xbf16, #tpu.memory_space<vmem>>, vector<4x256xbf16>,
    %c16_i32_46 = arith.constant 16 : i32
    %90 = tpu.dynamic_rotate %83 by %c16_i32_46 dim 1 : vector<4x256xf32>, i32 -> vector<4x256xf32>
    %c1_47 = arith.constant 1 : index
    %c0_48 = arith.constant 0 : index
    %91 = vector.load %arg5[%c1_47, %c0_48] : memref<9x256xf32, #tpu.memory_space<vmem>>, vector<1x256xf32>
    %92 = vector.broadcast %91 : vector<1x256xf32> to vector<4x256xf32>
    %93 = arith.mulf %90, %92 : vector<4x256xf32>
    %94 = arith.truncf %93 : vector<4x256xf32> to vector<4x256xbf16>
    %c4_49 = arith.constant 4 : index
    %c0_50 = arith.constant 0 : index
    %95 = vector.load %arg8[%c4_49, %c0_50] : memref<36x256xbf16, #tpu.memory_space<vmem>>, vector<4x256xbf16>
    tpu.vector_store %arg8[%c4_49, %c0_50], %94 {strides = array<i32>} : memref<36x256xbf16, #tpu.memory_space<vmem>>, vector<4x256xbf16>,
    %c15_i32_51 = arith.constant 15 : i32
    %96 = tpu.dynamic_rotate %83 by %c15_i32_51 dim 1 : vector<4x256xf32>, i32 -> vector<4x256xf32>
    %c2_52 = arith.constant 2 : index
    %c0_53 = arith.constant 0 : index
    %97 = vector.load %arg5[%c2_52, %c0_53] : memref<9x256xf32, #tpu.memory_space<vmem>>, vector<1x256xf32>
    %98 = vector.broadcast %97 : vector<1x256xf32> to vector<4x256xf32>
    %99 = arith.mulf %96, %98 : vector<4x256xf32>
    %100 = arith.truncf %99 : vector<4x256xf32> to vector<4x256xbf16>
    %c8_54 = arith.constant 8 : index
    %c0_55 = arith.constant 0 : index
    %101 = vector.load %arg8[%c8_54, %c0_55] : memref<36x256xbf16, #tpu.memory_space<vmem>>, vector<4x256xbf16>
    tpu.vector_store %arg8[%c8_54, %c0_55], %100 {strides = array<i32>} : memref<36x256xbf16, #tpu.memory_space<vmem>>, vector<4x256xbf16>,
    %c1_i32_56 = arith.constant 1 : i32
    %102 = tpu.dynamic_rotate %83 by %c1_i32_56 dim 1 : vector<4x256xf32>, i32 -> vector<4x256xf32>
    %c3_57 = arith.constant 3 : index
    %c0_58 = arith.constant 0 : index
    %103 = vector.load %arg5[%c3_57, %c0_58] : memref<9x256xf32, #tpu.memory_space<vmem>>, vector<1x256xf32>
    %104 = vector.broadcast %103 : vector<1x256xf32> to vector<4x256xf32>
    %105 = arith.mulf %102, %104 : vector<4x256xf32>
    %106 = arith.truncf %105 : vector<4x256xf32> to vector<4x256xbf16>
    %c12_59 = arith.constant 12 : index
    %c0_60 = arith.constant 0 : index
    %107 = vector.load %arg8[%c12_59, %c0_60] : memref<36x256xbf16, #tpu.memory_space<vmem>>, vector<4x256xbf16>
    tpu.vector_store %arg8[%c12_59, %c0_60], %106 {strides = array<i32>} : memref<36x256xbf16, #tpu.memory_space<vmem>>, vector<4x256xbf16>,
    %108 = arith.truncf %83 : vector<4x256xf32> to vector<4x256xbf16>
    %c16_61 = arith.constant 16 : index
    %c0_62 = arith.constant 0 : index
    %109 = vector.load %arg8[%c16_61, %c0_62] : memref<36x256xbf16, #tpu.memory_space<vmem>>, vector<4x256xbf16>
    tpu.vector_store %arg8[%c16_61, %c0_62], %108 {strides = array<i32>} : memref<36x256xbf16, #tpu.memory_space<vmem>>, vector<4x256xbf16>,
    %c255_i32_63 = arith.constant 255 : i32
    %110 = tpu.dynamic_rotate %83 by %c255_i32_63 dim 1 : vector<4x256xf32>, i32 -> vector<4x256xf32>
    %c5_64 = arith.constant 5 : index
    %c0_65 = arith.constant 0 : index
    %111 = vector.load %arg5[%c5_64, %c0_65] : memref<9x256xf32, #tpu.memory_space<vmem>>, vector<1x256xf32>
    %112 = vector.broadcast %111 : vector<1x256xf32> to vector<4x256xf32>
    %113 = arith.mulf %110, %112 : vector<4x256xf32>
    %114 = arith.truncf %113 : vector<4x256xf32> to vector<4x256xbf16>
    %c20_66 = arith.constant 20 : index
    %c0_67 = arith.constant 0 : index
    %115 = vector.load %arg8[%c20_66, %c0_67] : memref<36x256xbf16, #tpu.memory_space<vmem>>, vector<4x256xbf16>
    tpu.vector_store %arg8[%c20_66, %c0_67], %114 {strides = array<i32>} : memref<36x256xbf16, #tpu.memory_space<vmem>>, vector<4x256xbf16>,
    %c241_i32_68 = arith.constant 241 : i32
    %116 = tpu.dynamic_rotate %83 by %c241_i32_68 dim 1 : vector<4x256xf32>, i32 -> vector<4x256xf32>
    %c6_69 = arith.constant 6 : index
    %c0_70 = arith.constant 0 : index
    %117 = vector.load %arg5[%c6_69, %c0_70] : memref<9x256xf32, #tpu.memory_space<vmem>>, vector<1x256xf32>
    %118 = vector.broadcast %117 : vector<1x256xf32> to vector<4x256xf32>
    %119 = arith.mulf %116, %118 : vector<4x256xf32>
    %120 = arith.truncf %119 : vector<4x256xf32> to vector<4x256xbf16>
    %c24_71 = arith.constant 24 : index
    %c0_72 = arith.constant 0 : index
    %121 = vector.load %arg8[%c24_71, %c0_72] : memref<36x256xbf16, #tpu.memory_space<vmem>>, vector<4x256xbf16>
    tpu.vector_store %arg8[%c24_71, %c0_72], %120 {strides = array<i32>} : memref<36x256xbf16, #tpu.memory_space<vmem>>, vector<4x256xbf16>,
    %c240_i32_73 = arith.constant 240 : i32
    %122 = tpu.dynamic_rotate %83 by %c240_i32_73 dim 1 : vector<4x256xf32>, i32 -> vector<4x256xf32>
    %c7_74 = arith.constant 7 : index
    %c0_75 = arith.constant 0 : index
    %123 = vector.load %arg5[%c7_74, %c0_75] : memref<9x256xf32, #tpu.memory_space<vmem>>, vector<1x256xf32>
    %124 = vector.broadcast %123 : vector<1x256xf32> to vector<4x256xf32>
    %125 = arith.mulf %122, %124 : vector<4x256xf32>
    %126 = arith.truncf %125 : vector<4x256xf32> to vector<4x256xbf16>
    %c28_76 = arith.constant 28 : index
    %c0_77 = arith.constant 0 : index
    %127 = vector.load %arg8[%c28_76, %c0_77] : memref<36x256xbf16, #tpu.memory_space<vmem>>, vector<4x256xbf16>
    tpu.vector_store %arg8[%c28_76, %c0_77], %126 {strides = array<i32>} : memref<36x256xbf16, #tpu.memory_space<vmem>>, vector<4x256xbf16>,
    %c239_i32_78 = arith.constant 239 : i32
    %128 = tpu.dynamic_rotate %83 by %c239_i32_78 dim 1 : vector<4x256xf32>, i32 -> vector<4x256xf32>
    %c8_79 = arith.constant 8 : index
    %c0_80 = arith.constant 0 : index
    %129 = vector.load %arg5[%c8_79, %c0_80] : memref<9x256xf32, #tpu.memory_space<vmem>>, vector<1x256xf32>
    %130 = vector.broadcast %129 : vector<1x256xf32> to vector<4x256xf32>
    %131 = arith.mulf %128, %130 : vector<4x256xf32>
    %132 = arith.truncf %131 : vector<4x256xf32> to vector<4x256xbf16>
    %c32_81 = arith.constant 32 : index
    %c0_82 = arith.constant 0 : index
    %133 = vector.load %arg8[%c32_81, %c0_82] : memref<36x256xbf16, #tpu.memory_space<vmem>>, vector<4x256xbf16>
    tpu.vector_store %arg8[%c32_81, %c0_82], %132 {strides = array<i32>} : memref<36x256xbf16, #tpu.memory_space<vmem>>, vector<4x256xbf16>,
    %c0_83 = arith.constant 0 : index
    %c0_84 = arith.constant 0 : index
    %134 = vector.load %arg3[%c0_83, %c0_84] : memref<4x36xbf16, #tpu.memory_space<vmem>>, vector<4x36xbf16>
    %c0_85 = arith.constant 0 : index
    %c0_86 = arith.constant 0 : index
    %135 = vector.load %arg8[%c0_85, %c0_86] : memref<36x256xbf16, #tpu.memory_space<vmem>>, vector<36x256xbf16>
    %cst_87 = arith.constant dense<0.000000e+00> : vector<4x256xf32>
    %136 = tpu.matmul %134, %135, %cst_87 {dimension_numbers = #tpu.dot_dimension_numbers<[1], [0], [0], [1], [0, 0, 1, 1], [], []>} : vector<4x36xbf16>, vector<36x256xbf16>, vector<4x256xf32> -> vector<4x256xf32>
    %c0_88 = arith.constant 0 : index
    %c2_89 = arith.constant 2 : index
    %137 = vector.load %arg4[%c0_88, %c2_89] : memref<4x4xf32, #tpu.memory_space<vmem>>, vector<4x1xf32>
    %c0_90 = arith.constant 0 : index
    %c3_91 = arith.constant 3 : index
    %138 = vector.load %arg4[%c0_90, %c3_91] : memref<4x4xf32, #tpu.memory_space<vmem>>, vector<4x1xf32>
    %cst_92 = arith.constant dense<0.000000e+00> : vector<4xf32>
    %139 = vector.multi_reduction <add>, %136, %cst_92 [1] : vector<4x256xf32> to vector<4xf32>
    %140 = vector.shape_cast %139 : vector<4xf32> to vector<4x1xf32>
    %141 = arith.mulf %136, %136 : vector<4x256xf32>
    %cst_93 = arith.constant dense<0.000000e+00> : vector<4xf32>
    %142 = vector.multi_reduction <add>, %141, %cst_93 [1] : vector<4x256xf32> to vector<4xf32>
    %143 = vector.shape_cast %142 : vector<4xf32> to vector<4x1xf32>
    %cst_94 = arith.constant 3.906250e-03 : f32
    %144 = vector.broadcast %cst_94 : f32 to vector<4x1xf32>
    %145 = arith.mulf %140, %144 : vector<4x1xf32>
    %cst_95 = arith.constant 3.906250e-03 : f32
    %146 = vector.broadcast %cst_95 : f32 to vector<4x1xf32>
    %147 = arith.mulf %143, %146 : vector<4x1xf32>
    %148 = arith.mulf %145, %145 : vector<4x1xf32>
    %149 = arith.subf %147, %148 : vector<4x1xf32>
    %cst_96 = arith.constant 0.000000e+00 : f32
    %150 = vector.broadcast %cst_96 : f32 to vector<4x1xf32>
    %151 = arith.maximumf %149, %150 : vector<4x1xf32>
    %cst_97 = arith.constant 9.99999974E-6 : f32
    %152 = vector.broadcast %cst_97 : f32 to vector<4x1xf32>
    %153 = arith.addf %151, %152 : vector<4x1xf32>
    %154 = math.rsqrt %153 : vector<4x1xf32>
    %155 = arith.mulf %154, %137 : vector<4x1xf32>
    %156 = arith.mulf %145, %155 : vector<4x1xf32>
    %157 = arith.subf %138, %156 : vector<4x1xf32>
    %158 = vector.broadcast %155 : vector<4x1xf32> to vector<4x256xf32>
    %159 = arith.mulf %136, %158 : vector<4x256xf32>
    %160 = vector.broadcast %157 : vector<4x1xf32> to vector<4x256xf32>
    %161 = arith.addf %159, %160 : vector<4x256xf32>
    %c0_98 = arith.constant 0 : index
    %c0_99 = arith.constant 0 : index
    %c0_100 = arith.constant 0 : index
    %162 = vector.load %arg1[%c0_98, %c0_99, %c0_100] : memref<1x4x256xf32, #tpu.memory_space<vmem>>, vector<1x4x256xf32>
    %163 = vector.shape_cast %162 : vector<1x4x256xf32> to vector<4x256xf32>
    %164 = arith.addf %163, %161 : vector<4x256xf32>
    %c0_101 = arith.constant 0 : index
    %c0_102 = arith.constant 0 : index
    %c0_103 = arith.constant 0 : index
    %165 = vector.load %arg6[%c0_101, %c0_102, %c0_103] : memref<1x4x256xf32, #tpu.memory_space<vmem>>, vector<1x4x256xf32>
    %166 = vector.shape_cast %165 : vector<1x4x256xf32> to vector<4x256xf32>
    %167 = vector.shape_cast %164 : vector<4x256xf32> to vector<1x4x256xf32>
    tpu.vector_store %arg6[%c0_101, %c0_102, %c0_103], %167 {strides = array<i32>} : memref<1x4x256xf32, #tpu.memory_space<vmem>>, vector<1x4x256xf32>,
    return
  }
  func.func @transform_0(%arg0: i32) -> (i32, i32, i32) {
    %c0_i32 = arith.constant 0 : i32
    %c0_i32_0 = arith.constant 0 : i32
    %c0_i32_1 = arith.constant 0 : i32
    return %arg0, %c0_i32, %c0_i32_0 : i32, i32, i32
  }
  func.func @transform_1(%arg0: i32) -> (i32, i32) {
    %c0_i32 = arith.constant 0 : i32
    %c0_i32_0 = arith.constant 0 : i32
    %c0_i32_1 = arith.constant 0 : i32
    return %c0_i32, %c0_i32_0 : i32, i32
  }
  func.func @transform_2(%arg0: i32) -> (i32, i32) {
    %c0_i32 = arith.constant 0 : i32
    %c0_i32_0 = arith.constant 0 : i32
    %c0_i32_1 = arith.constant 0 : i32
    return %c0_i32, %c0_i32_0 : i32, i32
  }
  func.func @transform_3(%arg0: i32) -> (i32, i32) {
    %c0_i32 = arith.constant 0 : i32
    %c0_i32_0 = arith.constant 0 : i32
    %c0_i32_1 = arith.constant 0 : i32
    return %c0_i32, %c0_i32_0 : i32, i32
  }
  func.func @transform_4(%arg0: i32) -> (i32, i32) {
    %c0_i32 = arith.constant 0 : i32
    %c0_i32_0 = arith.constant 0 : i32
    %c0_i32_1 = arith.constant 0 : i32
    return %c0_i32, %c0_i32_0 : i32, i32
  }
  func.func @transform_5(%arg0: i32) -> (i32, i32, i32) {
    %c0_i32 = arith.constant 0 : i32
    %c0_i32_0 = arith.constant 0 : i32
    %c0_i32_1 = arith.constant 0 : i32
    return %arg0, %c0_i32, %c0_i32_0 : i32, i32, i32
  }
}

</mosaic_0001>

<bundles_post_ra>
// kernel: residual_block_forward.1
= control target key start
LH: loop header
LB: loop body
LE: loop exit
PB: predicated region body
PF: predicated region fallthrough
CT: control target
= control target key end

     0   :  { %s1232_s18 = smov 0   ;;  %s1488_s0 = inlined_call_operand.vmem [shape: f32[2,4,256], index: 0, kind: input, shape index: {}]   ;;  %s1489_s1 = inlined_call_operand.vmem [shape: bf16[4,36], index: 1, kind: input, shape index: {}]   ;;  %s1490_s2 = inlined_call_operand.vmem [shape: bf16[4,36], index: 2, kind: input, shape index: {}]   ;;  %s1491_s3 = inlined_call_operand.vmem [shape: f32[4,4], index: 3, kind: input, shape index: {}]   ;;  %s1492_s4 = inlined_call_operand.vmem [shape: f32[9,256], index: 4, kind: input, shape index: {}]   ;;  %s1493_s5 = inlined_call_operand.vmem [shape: f32[2,4,256], index: 5, kind: output, shape index: {}]  }
   0x1 LB: > { %s1057_s19 = sadd.s32 4294967295, %s1188_s18   ;;  %p1061_p0 = scmp.ge.s32.totalorder %s1188_s18, 1  ;;  %s1188_s18 = sphi %s1232_s18, %s15_s18  }
   0x2   : > { %p187_p1 = scmp.lt.s32.totalorder %s1188_s18, 3 }
   0x4   : > { %p188_p2 = pnand %p1061_p0, %p187_p1 }
   0x5   : > { %p215_p3 = scmp.lt.s32.totalorder (!%p188_p2), %s1057_s19, 1  ;;  %s1190_s24 = smov (!%p188_p2), 1   ;;  %v1198_v3 = vmov (!%p188_p2), 0   ;;  %v234_v4 = vlaneseq (!%p188_p2)  ;;  %v1071_v9 = vld [vmem:[%s1492_s4 + $0x3] ss:$8 sm:$0x3] (!%p188_p2) }
   0x6   : > { %191 = sbr.rel (%p188_p2) target bundleno = 1614 (0x64e), region = 40  ;;  %s1191_s25 = smov (!%p188_p2), 16   ;;  %566 = vmatprep.mubr.bf16.mxu0 (!%p188_p2), %v1198_v3  ;;  %1157 = vset.pattern.permute.xlu1 (!%p188_p2), %v1198_v3  ;;  %v239_v14 = vld [vmem:[%s1492_s4] ss:$8 sm:$0x3] (!%p188_p2)  ;;  %vm527_vm8 = vcmask (!%p188_p2), 1041408  }
   0x7   : > { %s1192_s26 = smov (!%p188_p2), 17   ;;  %s1193_s27 = smov (!%p188_p2), 15   ;;  %945 = vmatprep.mubr.bf16.mxu1 (!%p188_p2), %v1198_v3  ;;  %v242_v5 = vshrl.u32 (!%p188_p2), %v234_v4, 7  ;;  %v1277_v6 = vand.u32 (!%p188_p2), 127, %v234_v4  ;;  %vm523_vm9 = vcmask (!%p188_p2), 293888   ;;  %vm576_vm10 = vcmask (!%p188_p2), 1043456  }
   0x8   : > { %s1194_s28 = smov (!%p188_p2), 127   ;;  %s1195_s29 = smov (!%p188_p2), 112   ;;  %v1067_v15 = vld [vmem:[%s1492_s4 + $0x1] ss:$8 sm:$0x3] (!%p188_p2) }
   0x9   : > { %s1196_s30 = smov (!%p188_p2), 113   ;;  %s1197_s6 = smov (!%p188_p2), 111   ;;  %v1279_v7 = vsub.s32 (!%p188_p2), 0, %v242_v5  ;;  %v1281_v8 = vsub.s32 (!%p188_p2), 1, %v242_v5  ;;  %vm329_vm0 = vcmp.lt.s32.totalorder (!%p188_p2), %v1277_v6, 1  ;;  %vm236_vm1 = vcmp.lt.s32.totalorder (!%p188_p2), %v1277_v6, 17 }
   0xa   : > { %vm266_vm2 = vcmp.lt.s32.totalorder (!%p188_p2), %v1277_v6, 16  ;;  %v1069_v21 = vld [vmem:[%s1492_s4 + $0x2] ss:$8 sm:$0x3] (!%p188_p2)  ;;  %vm298_vm3 = vcmp.lt.s32.totalorder (!%p188_p2), %v1277_v6, 15  ;;  %vm370_vm4 = vcmp.lt.s32.totalorder (!%p188_p2), %v1277_v6, 127 }
   0xb   : > { %v338_v12 = vrot.slane (!%p188_p2), %v1071_v9, %v1279_v7  ;;  %v342_v13 = vrot.slane (!%p188_p2), %v1071_v9, %v1281_v8  ;;  %v244_v20 = vrot.slane (!%p188_p2), %v239_v14, %v1279_v7  ;;  %v248_v24 = vrot.slane (!%p188_p2), %v239_v14, %v1281_v8  ;;  %v1074_v41 = vld [vmem:[%s1492_s4 + $0x5] ss:$8 sm:$0x3] (!%p188_p2)  ;;  %v1078_v53 = vld [vmem:[%s1492_s4 + $0x7] ss:$8 sm:$0x3] (!%p188_p2) }
   0xc   : > { %v275_v25 = vrot.slane (!%p188_p2), %v1067_v15, %v1279_v7  ;;  %v279_v26 = vrot.slane (!%p188_p2), %v1067_v15, %v1281_v8  ;;  %v307_v30 = vrot.slane (!%p188_p2), %v1069_v21, %v1279_v7  ;;  %v311_v31 = vrot.slane (!%p188_p2), %v1069_v21, %v1281_v8  ;;  %v1076_v63 = vld [vmem:[%s1492_s4 + $0x6] ss:$8 sm:$0x3] (!%p188_p2)  ;;  %v1080_v14 = vld [vmem:[%s1492_s4 + $0x10] ss:$8 sm:$0x3] (!%p188_p2) }
   0xd   : > { %s1495_s19 = smov (!%p215_p3, %s1057_s19), 1  ;;  %v379_v50 = vrot.slane %v1074_v41, %v1279_v7  ;;  %v383_v51 = vrot.slane %v1074_v41, %v1281_v8  ;;  %vm433_vm5 = vcmp.lt.s32.totalorder %v1277_v6, 112  ;;  %v442_v61 = vrot.slane %v1078_v53, %v1279_v7  ;;  %v492_v41 = vld [vmem:[%s1489_s1] sm:$0x3] }
   0xe   : > { %s1116_s20 = sshll.u32 %s1495_s19, 3  ;;  %v446_v62 = vrot.slane %v1078_v53, %v1281_v8  ;;  %vm402_vm6 = vcmp.lt.s32.totalorder %v1277_v6, 113  ;;  %v411_v9 = vrot.slane %v1076_v63, %v1279_v7  ;;  %vm465_vm7 = vcmp.lt.s32.totalorder %v1277_v6, 111  ;;  %v873_v6 = vld [vmem:[%s1490_s2] sm:$0x3] }
   0xf   : > { %s219_s23 = scalar_lea.vmem %s1488_s0, %s1116_s20  ;;  %v474_v21 = vrot.slane %v1080_v14, %v1279_v7  ;;  %s224_s13 = scalar_lea.vmem %s1493_s5, %s1116_s20 }
  0x10   : > { %v1248_v0 = vld [vmem:[%s219_s23] sm:$0xff] }
  0x11   : > { %325 = vrot.lane.b32.xlu1 %v1248_v0, %s1190_s24  ;;  %262 = vrot.lane.b32.xlu0 %v1248_v0, %s1191_s25  ;;  %v228_v1 = vcombine.high %v1248_v0, %v1248_v0 }
  0x13   : > { %v1122_v2 = vpack.c.bf16 %v228_v1, %v1248_v0 }
  0x15   : > { %230 = vrot.lane.b32.xlu0 %v1248_v0, %s1192_s26  ;;  %327 = vrot.lane.b32.xlu1 %v228_v1, %s1190_s24  ;;  %365 = vst [vmem:[#allocation3 + $0x10] sm:$0x33] %v1122_v2 }
  0x19   : > { %232 = vrot.lane.b32.xlu1 %v228_v1, %s1192_s26  ;;  %264 = vrot.lane.b32.xlu0 %v228_v1, %s1191_s25 }
  0x1d   : > { %296 = vrot.lane.b32.xlu1 %v228_v1, %s1193_s27  ;;  %294 = vrot.lane.b32.xlu0 %v1248_v0, %s1193_s27 }
  0x21   : > { %368 = vrot.lane.b32.xlu1 %v228_v1, %s1194_s28  ;;  %366 = vrot.lane.b32.xlu0 %v1248_v0, %s1194_s28 }
  0x25   : > { %431 = vrot.lane.b32.xlu1 %v228_v1, %s1195_s29  ;;  %429 = vrot.lane.b32.xlu0 %v1248_v0, %s1195_s29 }
  0x29   : > { %400 = vrot.lane.b32.xlu1 %v228_v1, %s1196_s30  ;;  %398 = vrot.lane.b32.xlu0 %v1248_v0, %s1196_s30 }
  0x2d   : > { %463 = vrot.lane.b32.xlu1 %v228_v1, %s1197_s6  ;;  %461 = vrot.lane.b32.xlu0 %v1248_v0, %s1197_s6 }
  0x83   : > { %v326_v10 = vpop.permute.xlu1 %325  ;;  %v263_v11 = vpop.permute.xlu0 %262 }
  0x87   : > { %v231_v16 = vpop.permute.xlu0 %230  ;;  %v328_v17 = vpop.permute.xlu1 %327 }
  0x88   : > { %v330_v18 = vsel %vm329_vm0, %v326_v10, %v328_v17  ;;  %v331_v19 = vsel %vm329_vm0, %v328_v17, %v326_v10 }
  0x89   : > { %v345_v22 = vmul.f32 %v338_v12, %v331_v19  ;;  %v346_v23 = vmul.f32 %v342_v13, %v330_v18  ;;  %v415_v13 = vrot.slane %v1076_v63, %v1281_v8  ;;  %v575_v63 = vld [vmem:[%s1491_s3] sm:$0xf] }
  0x8b   : > { %v1121_v27 = vpack.c.bf16 %v346_v23, %v345_v22  ;;  %v233_v28 = vpop.permute.xlu1 %232  ;;  %v265_v29 = vpop.permute.xlu0 %264 }
  0x8c   : > { %v237_v32 = vsel %vm236_vm1, %v231_v16, %v233_v28  ;;  %v238_v33 = vsel %vm236_vm1, %v233_v28, %v231_v16  ;;  %v267_v34 = vsel %vm266_vm2, %v263_v11, %v265_v29  ;;  %v268_v35 = vsel %vm266_vm2, %v265_v29, %v263_v11 }
  0x8d   : > { %v354_v36 = vrot.slane %v1121_v27, 6  ;;  %v251_v37 = vmul.f32 %v244_v20, %v238_v33  ;;  %v252_v38 = vmul.f32 %v248_v24, %v237_v32  ;;  %v282_v39 = vmul.f32 %v275_v25, %v268_v35 }
  0x8e   : > { %v283_v40 = vmul.f32 %v279_v26, %v267_v34  ;;  %v478_v26 = vrot.slane %v1080_v14, %v1281_v8 }
  0x8f   : > { %356 = vst [vmem:[#allocation3 + $0x8] sm:$0xcc] %v354_v36  ;;  %v1118_v42 = vpack.c.bf16 %v252_v38, %v251_v37  ;;  %v297_v43 = vpop.permute.xlu1 %296  ;;  %v295_v44 = vpop.permute.xlu0 %294 }
  0x90   : > { %v1119_v45 = vpack.c.bf16 %v283_v40, %v282_v39  ;;  %v299_v46 = vsel %vm298_vm3, %v295_v44, %v297_v43  ;;  %v300_v47 = vsel %vm298_vm3, %v297_v43, %v295_v44 }
  0x91   : > { %261 = vst [vmem:[#allocation3] sm:$0x33] %v1118_v42  ;;  %v314_v48 = vmul.f32 %v307_v30, %v300_v47  ;;  %v315_v49 = vmul.f32 %v311_v31, %v299_v46 }
  0x92   : > { %v291_v52 = vrot.slane %v1119_v45, 6 }
  0x93   : > { %v1120_v54 = vpack.c.bf16 %v315_v49, %v314_v48  ;;  %v369_v55 = vpop.permute.xlu1 %368  ;;  %v367_v56 = vpop.permute.xlu0 %366 }
  0x94   : > { %293 = vst [vmem:[#allocation3] sm:$0xcc] %v291_v52  ;;  %v371_v57 = vsel %vm370_vm4, %v367_v56, %v369_v55  ;;  %v372_v58 = vsel %vm370_vm4, %v369_v55, %v367_v56 }
  0x95   : > { %324 = vst [vmem:[#allocation3 + $0x8] sm:$0x33] %v1120_v54  ;;  %v386_v59 = vmul.f32 %v379_v50, %v371_v57  ;;  %v387_v60 = vmul.f32 %v383_v51, %v372_v58 }
  0x97   : > { %v1123_v1 = vpack.c.bf16 %v387_v60, %v386_v59  ;;  %v432_v2 = vpop.permute.xlu1 %431  ;;  %v430_v3 = vpop.permute.xlu0 %429 }
  0x98   : > { %v434_v4 = vsel %vm433_vm5, %v430_v3, %v432_v2  ;;  %v435_v5 = vsel %vm433_vm5, %v432_v2, %v430_v3 }
  0x99   : > { %v395_v10 = vrot.slane %v1123_v1, 6  ;;  %v449_v11 = vmul.f32 %v442_v61, %v434_v4  ;;  %v450_v12 = vmul.f32 %v446_v62, %v435_v5  ;;  %v1199_v62 = vmov 1  }
  0x9a   : > { %1158 = vset.pattern.permute.xlu0 %v1199_v62 }
  0x9b   : > { %397 = vst [vmem:[#allocation3 + $0x10] sm:$0xcc] %v395_v10  ;;  %v1125_v15 = vpack.c.bf16 %v450_v12, %v449_v11  ;;  %v401_v16 = vpop.permute.xlu1 %400  ;;  %v399_v17 = vpop.permute.xlu0 %398 }
  0x9c   : > { %v403_v18 = vsel %vm402_vm6, %v399_v17, %v401_v16  ;;  %v404_v19 = vsel %vm402_vm6, %v401_v16, %v399_v17  ;;  %v1162_v20 = vld [vmem:[#allocation3 + $0x4] ss:$8 sps:$4 sm:$0xff]   ;;  %v1164_v22 = vld [vmem:[#allocation3] ss:$8 sps:$4 sm:$0xff]  }
  0x9d   : > { %v458_v23 = vrot.slane %v1125_v15, 6  ;;  %v418_v24 = vmul.f32 %v411_v9, %v403_v18  ;;  %v419_v25 = vmul.f32 %v415_v13, %v404_v19  ;;  %534 = vmatprep.subr.bf16.mxu0 %v1162_v20  ;;  %v1091_v20 = vld [vmem:[%s1492_s4 + $0x1] ss:$8 sm:$0x3] }
  0x9e   : > { %535 = vmatpush1.bf16.msra.mxu0 %v1164_v22 }
  0x9f   : > { %460 = vst [vmem:[#allocation3 + $0x18] sm:$0xcc] %v458_v23  ;;  %v1124_v27 = vpack.c.bf16 %v419_v25, %v418_v24  ;;  %v464_v28 = vpop.permute.xlu1 %463  ;;  %v462_v29 = vpop.permute.xlu0 %461  ;;  %v668_v23 = vrot.slane %v1091_v20, %v1279_v7  ;;  %v672_v24 = vrot.slane %v1091_v20, %v1281_v8  ;;  %v1095_v25 = vld [vmem:[%s1492_s4 + $0x3] ss:$8 sm:$0x3] }
  0xa0   : > { %v466_v30 = vsel %vm465_vm7, %v462_v29, %v464_v28  ;;  %v467_v31 = vsel %vm465_vm7, %v464_v28, %v462_v29 }
  0xa1   : > { %428 = vst [vmem:[#allocation3 + $0x18] sm:$0x33] %v1124_v27  ;;  %v481_v32 = vmul.f32 %v474_v21, %v466_v30  ;;  %v482_v33 = vmul.f32 %v478_v26, %v467_v31 }
  0xa3   : > { %v1126_v34 = vpack.c.bf16 %v482_v33, %v481_v32  ;;  %v727_v32 = vrot.slane %v1095_v25, %v1279_v7  ;;  %v731_v33 = vrot.slane %v1095_v25, %v1281_v8 }
  0xa5   : > { %491 = vst [vmem:[#allocation3 + $0x20] sm:$0x33] %v1126_v34  ;;  %v634_v34 = vld [vmem:[%s1492_s4] ss:$8 sm:$0x3] }
  0xa8   : > { %v1165_v35 = vld [vmem:[#allocation3 + $0x14] ss:$8 sps:$4 sm:$0xff]   ;;  %v1167_v36 = vld [vmem:[#allocation3 + $0x10] ss:$8 sps:$4 sm:$0xff]  }
  0xa9   : > { %536 = vmatprep.subr.bf16.mxu0 %v1165_v35 }
  0xaa   : > { %537 = vmatpush1.bf16.msra.mxu0 %v1167_v36 }
  0xac   : > { %v497_v37 = vld [vmem:[#allocation3 + $0x20] sm:$0x33] }
  0xad   : > { %v1087_v38 = vcombine.high %v497_v37, %v497_v37  ;;  %v1086_v39 = vcombine.low %v497_v37, %v497_v37 }
  0xaf   : > { %1088 = vmatprep.subr.msk.bf16.mxu0 %vm527_vm8, %v1087_v38  ;;  %v529_v40 = vsel %vm527_vm8, %v1086_v39, 0 }
  0xb0   : > { %539 = vmatpush1.bf16.msra.mxu0 %v529_v40  ;;  %v639_v40 = vrot.slane %v634_v34, %v1279_v7 }
  0xb3   : > { %1089 = vmatmul.mubr.msk.bf16.vlgmr.msra.gmra.mrb[0].mxu0 %vm523_vm9, %v492_v41 }
 0x186   : > { %v568_v42 = vpop.f32.mrb[0].mxu0 }
 0x187   : > { %v582_v43 = vmul.f32 %v568_v42, %v568_v42  ;;  %v570_v44 = vpop.f32.mrb[1].mxu0  ;;  %v577_v45 = vsel %vm576_vm10, %v568_v42, 0.0 }
 0x188   : > { %v583_v46 = vmul.f32 %v570_v44, %v570_v44  ;;  %v572_v47 = vpop.f32.mrb[2].mxu0  ;;  %v578_v48 = vsel %vm576_vm10, %v570_v44, 0.0 }
 0x189   : > { %v573_v49 = vpop.f32.mrb[3].mxu0  ;;  %v579_v50 = vadd.f32 %v578_v48, %v577_v45  ;;  %v584_v51 = vsel %vm576_vm10, %v582_v43, 0.0  ;;  %v1093_v45 = vld [vmem:[%s1492_s4 + $0x2] ss:$8 sm:$0x3] }
 0x18a   : > { %v585_v52 = vsel %vm576_vm10, %v583_v46, 0.0 }
 0x18b   : > { %580 = vadd.xlane.f32.xlu0 %v579_v50  ;;  %v586_v53 = vadd.f32 %v585_v52, %v584_v51  ;;  %v698_v50 = vrot.slane %v1093_v45, %v1279_v7 }
 0x18d   : > { %587 = vadd.xlane.f32.xlu1 %v586_v53 }
 0x218   : > { %v581_v54 = vpop.xlane.xlu0 %580 }
 0x219   : > { %v589_v55 = vmul.f32 0.00390625, %v581_v54 }
 0x21a   : > { %v588_v56 = vpop.xlane.xlu1 %587 }
 0x21b   : > { %v591_v57 = vmul.f32 %v589_v55, %v589_v55  ;;  %v590_v58 = vmul.f32 0.00390625, %v588_v56  ;;  %v1098_v56 = vld [vmem:[%s1492_s4 + $0x5] ss:$8 sm:$0x3] }
 0x21d   : > { %v592_v59 = vsub.f32 %v590_v58, %v591_v57 }
 0x21f   : > { %v593_v60 = vmax.f32 %v592_v59, 0.0 }
 0x221   : > { %v594_v61 = vadd.f32 1e-05, %v593_v60 }
 0x223   : > { %1178 = vrsqrt.f32 %v594_v61 }
 0x22d   : > { %v1179_v1 = vpop.eup %1178 }
 0x22e   : > { %v596_v2 = vmul.f32 %v1179_v1, %v575_v63  ;;  %v770_v1 = vrot.slane %v1098_v56, %v1281_v8 }
 0x230   : > { %605 = vperm.xlu1 %1157, %v596_v2   ;;  %v597_v3 = vmul.f32 %v596_v2, %v589_v55  ;;  %v702_v55 = vrot.slane %v1093_v45, %v1281_v8  ;;  %v1102_v2 = vld [vmem:[%s1492_s4 + $0x7] ss:$8 sm:$0x3] }
 0x232   : > { %599 = vrot.lane.b32.xlu0 %v597_v3, %s1190_s24 }
 0x2a4   : > { %v600_v4 = vpop.permute.xlu0 %599 }
 0x2a5   : > { %v602_v5 = vsub.f32 %v575_v63, %v600_v4  ;;  %v766_v63 = vrot.slane %v1098_v56, %v1279_v7 }
 0x2a7   : > { %612 = vperm.xlu0 %1158, %v602_v5  }
 0x2af   : > { %v606_v9 = vpop.permute.xlu1 %605 }
 0x2b0   : > { %v608_v10 = vmul.f32 %v606_v9, %v568_v42  ;;  %v609_v11 = vmul.f32 %v606_v9, %v570_v44  ;;  %v643_v44 = vrot.slane %v634_v34, %v1281_v8 }
 0x326   : > { %v613_v12 = vpop.permute.xlu0 %612 }
 0x327   : > { %v615_v13 = vadd.f32 %v613_v12, %v608_v10  ;;  %v616_v14 = vadd.f32 %v613_v12, %v609_v11 }
 0x329   : > { %v617_v15 = vmax.f32 %v615_v13, 0.0  ;;  %v618_v16 = vmax.f32 %v616_v14, 0.0  ;;  %v825_v13 = vrot.slane %v1102_v2, %v1279_v7  ;;  %v829_v14 = vrot.slane %v1102_v2, %v1281_v8 }
 0x32b   : > { %v621_v17 = vcombine.low %v617_v15, %v618_v16  ;;  %v1136_v18 = vcombine.low %v618_v16, %v618_v16  ;;  %v1100_v15 = vld [vmem:[%s1492_s4 + $0x6] ss:$8 sm:$0x3] }
 0x32c   : > { %v796_v20 = vrot.slane %v1100_v15, %v1279_v7  ;;  %v800_v25 = vrot.slane %v1100_v15, %v1281_v8 }
 0x32d   : > { %716 = vrot.lane.b32.xlu0 %v621_v17, %s1190_s24  ;;  %657 = vrot.lane.b32.xlu1 %v621_v17, %s1191_s25  ;;  %v1131_v19 = vpack.c.bf16 %v1136_v18, %v621_v17 }
 0x32f   : > { %754 = vst [vmem:[#allocation3 + $0x10] sm:$0x33] %v1131_v19 }
 0x331   : > { %628 = vrot.lane.b32.xlu0 %v621_v17, %s1192_s26  ;;  %659 = vrot.lane.b32.xlu1 %v1136_v18, %s1191_s25 }
 0x335   : > { %687 = vrot.lane.b32.xlu0 %v621_v17, %s1193_s27  ;;  %718 = vrot.lane.b32.xlu1 %v1136_v18, %s1190_s24 }
 0x339   : > { %755 = vrot.lane.b32.xlu0 %v621_v17, %s1194_s28  ;;  %630 = vrot.lane.b32.xlu1 %v1136_v18, %s1192_s26 }
 0x33d   : > { %814 = vrot.lane.b32.xlu0 %v621_v17, %s1195_s29  ;;  %689 = vrot.lane.b32.xlu1 %v1136_v18, %s1193_s27 }
 0x341   : > { %785 = vrot.lane.b32.xlu0 %v621_v17, %s1196_s30  ;;  %757 = vrot.lane.b32.xlu1 %v1136_v18, %s1194_s28 }
 0x345   : > { %844 = vrot.lane.b32.xlu0 %v621_v17, %s1197_s6  ;;  %816 = vrot.lane.b32.xlu1 %v1136_v18, %s1195_s29 }
 0x349   : > { %787 = vrot.lane.b32.xlu1 %v1136_v18, %s1196_s30 }
 0x34d   : > { %846 = vrot.lane.b32.xlu1 %v1136_v18, %s1197_s6 }
 0x39f   : > { %v717_v21 = vpop.permute.xlu0 %716  ;;  %v658_v22 = vpop.permute.xlu1 %657 }
 0x3a3   : > { %v629_v26 = vpop.permute.xlu0 %628  ;;  %v660_v27 = vpop.permute.xlu1 %659 }
 0x3a4   : > { %v661_v28 = vsel %vm266_vm2, %v658_v22, %v660_v27  ;;  %v662_v29 = vsel %vm266_vm2, %v660_v27, %v658_v22 }
 0x3a5   : > { %v675_v30 = vmul.f32 %v668_v23, %v662_v29  ;;  %v676_v31 = vmul.f32 %v672_v24, %v661_v28 }
 0x3a7   : > { %v1128_v35 = vpack.c.bf16 %v676_v31, %v675_v30  ;;  %v688_v36 = vpop.permute.xlu0 %687  ;;  %v719_v37 = vpop.permute.xlu1 %718 }
 0x3a8   : > { %v720_v38 = vsel %vm329_vm0, %v717_v21, %v719_v37  ;;  %v721_v39 = vsel %vm329_vm0, %v719_v37, %v717_v21 }
 0x3a9   : > { %v684_v41 = vrot.slane %v1128_v35, 6  ;;  %v734_v42 = vmul.f32 %v727_v32, %v721_v39  ;;  %v735_v43 = vmul.f32 %v731_v33, %v720_v38 }
 0x3ab   : > { %686 = vst [vmem:[#allocation3] sm:$0xcc] %v684_v41  ;;  %v1130_v46 = vpack.c.bf16 %v735_v43, %v734_v42  ;;  %v631_v47 = vpop.permute.xlu1 %630  ;;  %v756_v52 = vpop.permute.xlu0 %755 }
 0x3ac   : > { %v632_v48 = vsel %vm236_vm1, %v629_v26, %v631_v47  ;;  %v633_v49 = vsel %vm236_vm1, %v631_v47, %v629_v26  ;;  %v1104_v26 = vld [vmem:[%s1492_s4 + $0x10] ss:$8 sm:$0x3] }
 0x3ad   : > { %v743_v51 = vrot.slane %v1130_v46, 6  ;;  %v646_v53 = vmul.f32 %v639_v40, %v633_v49  ;;  %v647_v54 = vmul.f32 %v643_v44, %v632_v48  ;;  %v855_v32 = vrot.slane %v1104_v26, %v1279_v7 }
 0x3ae   : > { %v859_v37 = vrot.slane %v1104_v26, %v1281_v8 }
 0x3af   : > { %745 = vst [vmem:[#allocation3 + $0x8] sm:$0xcc] %v743_v51  ;;  %v1127_v57 = vpack.c.bf16 %v647_v54, %v646_v53  ;;  %v690_v58 = vpop.permute.xlu1 %689  ;;  %v815_v3 = vpop.permute.xlu0 %814 }
 0x3b0   : > { %v691_v59 = vsel %vm298_vm3, %v688_v36, %v690_v58  ;;  %v692_v60 = vsel %vm298_vm3, %v690_v58, %v688_v36 }
 0x3b1   : > { %656 = vst [vmem:[#allocation3] sm:$0x33] %v1127_v57  ;;  %v705_v61 = vmul.f32 %v698_v50, %v692_v60  ;;  %v706_v62 = vmul.f32 %v702_v55, %v691_v59 }
 0x3b3   : > { %v1129_v4 = vpack.c.bf16 %v706_v62, %v705_v61  ;;  %v758_v5 = vpop.permute.xlu1 %757  ;;  %v786_v21 = vpop.permute.xlu0 %785  ;;  %v1200_v62 = vmov 2  }
 0x3b4   : > { %v759_v9 = vsel %vm370_vm4, %v756_v52, %v758_v5  ;;  %v760_v10 = vsel %vm370_vm4, %v758_v5, %v756_v52  ;;  %1159 = vset.pattern.permute.xlu1 %v1200_v62 }
 0x3b5   : > { %715 = vst [vmem:[#allocation3 + $0x8] sm:$0x33] %v1129_v4  ;;  %v773_v11 = vmul.f32 %v766_v63, %v759_v9  ;;  %v774_v12 = vmul.f32 %v770_v1, %v760_v10 }
 0x3b7   : > { %v1132_v16 = vpack.c.bf16 %v774_v12, %v773_v11  ;;  %v817_v17 = vpop.permute.xlu1 %816  ;;  %v845_v38 = vpop.permute.xlu0 %844  ;;  %v1201_v11 = vmov 3   ;;  %v954_v12 = vld [vmem:[%s1491_s3] sm:$0xf] }
 0x3b8   : > { %v818_v18 = vsel %vm433_vm5, %v815_v3, %v817_v17  ;;  %v819_v19 = vsel %vm433_vm5, %v817_v17, %v815_v3  ;;  %1160 = vset.pattern.permute.xlu0 %v1201_v11 }
 0x3b9   : > { %v782_v22 = vrot.slane %v1132_v16, 6  ;;  %v832_v23 = vmul.f32 %v825_v13, %v818_v18  ;;  %v833_v24 = vmul.f32 %v829_v14, %v819_v19 }
 0x3bb   : > { %784 = vst [vmem:[#allocation3 + $0x10] sm:$0xcc] %v782_v22  ;;  %v1134_v27 = vpack.c.bf16 %v833_v24, %v832_v23  ;;  %v788_v28 = vpop.permute.xlu1 %787 }
 0x3bc   : > { %v789_v29 = vsel %vm402_vm6, %v786_v21, %v788_v28  ;;  %v790_v30 = vsel %vm402_vm6, %v788_v28, %v786_v21  ;;  %v1170_v31 = vld [vmem:[#allocation3 + $0x4] ss:$8 sps:$4 sm:$0xff]   ;;  %v1172_v33 = vld [vmem:[#allocation3] ss:$8 sps:$4 sm:$0xff]  }
 0x3bd   : > { %v841_v34 = vrot.slane %v1134_v27, 6  ;;  %v803_v35 = vmul.f32 %v796_v20, %v789_v29  ;;  %v804_v36 = vmul.f32 %v800_v25, %v790_v30  ;;  %913 = vmatprep.subr.bf16.mxu1 %v1170_v31 }
 0x3be   : > { %914 = vmatpush1.bf16.msra.mxu1 %v1172_v33 }
 0x3bf   : > { %843 = vst [vmem:[#allocation3 + $0x18] sm:$0xcc] %v841_v34  ;;  %v1133_v39 = vpack.c.bf16 %v804_v36, %v803_v35  ;;  %v847_v40 = vpop.permute.xlu1 %846 }
 0x3c0   : > { %v848_v41 = vsel %vm465_vm7, %v845_v38, %v847_v40  ;;  %v849_v42 = vsel %vm465_vm7, %v847_v40, %v845_v38 }
 0x3c1   : > { %813 = vst [vmem:[#allocation3 + $0x18] sm:$0x33] %v1133_v39  ;;  %v862_v7 = vmul.f32 %v855_v32, %v848_v41  ;;  %v863_v43 = vmul.f32 %v859_v37, %v849_v42 }
 0x3c3   : > { %v1135_v44 = vpack.c.bf16 %v863_v43, %v862_v7 }
 0x3c5   : > { %872 = vst [vmem:[#allocation3 + $0x20] sm:$0x33] %v1135_v44 }
 0x3c8   : > { %v1173_v45 = vld [vmem:[#allocation3 + $0x14] ss:$8 sps:$4 sm:$0xff]   ;;  %v1175_v46 = vld [vmem:[#allocation3 + $0x10] ss:$8 sps:$4 sm:$0xff]  }
 0x3c9   : > { %915 = vmatprep.subr.bf16.mxu1 %v1173_v45 }
 0x3ca   : > { %916 = vmatpush1.bf16.msra.mxu1 %v1175_v46 }
 0x3cc   : > { %v878_v8 = vld [vmem:[#allocation3 + $0x20] sm:$0x33] }
 0x3cd   : > { %v1111_v47 = vcombine.high %v878_v8, %v878_v8  ;;  %v1110_v48 = vcombine.low %v878_v8, %v878_v8 }
 0x3cf   : > { %1112 = vmatprep.subr.msk.bf16.mxu1 %vm527_vm8, %v1111_v47  ;;  %v908_v49 = vsel %vm527_vm8, %v1110_v48, 0 }
 0x3d0   : > { %918 = vmatpush1.bf16.msra.mxu1 %v908_v49 }
 0x3d3   : > { %1113 = vmatmul.mubr.msk.bf16.vlgmr.msra.gmra.mrb[0].mxu1 %vm523_vm9, %v873_v6 }
 0x4a6   : > { %v947_v50 = vpop.f32.mrb[0].mxu1 }
 0x4a7   : > { %v960_v51 = vmul.f32 %v947_v50, %v947_v50  ;;  %v949_v52 = vpop.f32.mrb[1].mxu1  ;;  %v955_v53 = vsel %vm576_vm10, %v947_v50, 0.0 }
 0x4a8   : > { %v961_v54 = vmul.f32 %v949_v52, %v949_v52  ;;  %v951_v55 = vpop.f32.mrb[2].mxu1  ;;  %v956_v56 = vsel %vm576_vm10, %v949_v52, 0.0 }
 0x4a9   : > { %v952_v57 = vpop.f32.mrb[3].mxu1  ;;  %v957_v58 = vadd.f32 %v956_v56, %v955_v53  ;;  %v962_v59 = vsel %vm576_vm10, %v960_v51, 0.0 }
 0x4aa   : > { %v963_v60 = vsel %vm576_vm10, %v961_v54, 0.0 }
 0x4ab   : > { %958 = vadd.xlane.f32.xlu0 %v957_v58  ;;  %v964_v61 = vadd.f32 %v963_v60, %v962_v59 }
 0x4ad   : > { %965 = vadd.xlane.f32.xlu1 %v964_v61 }
 0x538   : > { %v959_v63 = vpop.xlane.xlu0 %958 }
 0x539   : > { %v967_v1 = vmul.f32 0.00390625, %v959_v63 }
 0x53a   : > { %v966_v2 = vpop.xlane.xlu1 %965 }
 0x53b   : > { %v969_v3 = vmul.f32 %v967_v1, %v967_v1  ;;  %v968_v4 = vmul.f32 0.00390625, %v966_v2 }
 0x53d   : > { %v970_v5 = vsub.f32 %v968_v4, %v969_v3 }
 0x53f   : > { %v971_v9 = vmax.f32 %v970_v5, 0.0 }
 0x541   : > { %v972_v10 = vadd.f32 1e-05, %v971_v9 }
 0x543   : > { %1180 = vrsqrt.f32 %v972_v10 }
 0x54d   : > { %v1181_v13 = vpop.eup %1180 }
 0x54e   : > { %v974_v14 = vmul.f32 %v1181_v13, %v954_v12 }
 0x550   : > { %983 = vperm.xlu1 %1159, %v974_v14   ;;  %v975_v15 = vmul.f32 %v974_v14, %v967_v1 }
 0x552   : > { %977 = vrot.lane.b32.xlu0 %v975_v15, %s1190_s24 }
 0x5c4   : > { %v978_v16 = vpop.permute.xlu0 %977 }
 0x5c5   : > { %v980_v17 = vsub.f32 %v954_v12, %v978_v16 }
 0x5c7   : > { %990 = vperm.xlu0 %1160, %v980_v17  }
 0x5cf   : > { %v984_v18 = vpop.permute.xlu1 %983 }
 0x5d0   : > { %v986_v19 = vmul.f32 %v984_v18, %v947_v50  ;;  %v987_v20 = vmul.f32 %v984_v18, %v949_v52 }
 0x646   : > { %v991_v21 = vpop.permute.xlu0 %990 }
 0x647   : > { %v993_v22 = vadd.f32 %v991_v21, %v986_v19  ;;  %v994_v23 = vadd.f32 %v991_v21, %v987_v20 }
 0x649   : > { %v998_v24 = vcombine.low %v993_v22, %v994_v23 }
 0x64b   : > { %v1000_v25 = vadd.f32 %v998_v24, %v1248_v0 }
 0x64d   : > { %1001 = vst [vmem:[%s224_s13] sm:$0xff] %v1000_v25 }
 0x64e PF: > { %s15_s18 = sadd.s32 1, %s1188_s18  }
 0x64f   : > { %p12_p4 = scmp.ge.s32.totalorder %s15_s18, 4  }
 0x651   :  { %14 = sbr.rel (!%p12_p4) target bundleno = 1 (0x1), region = 77 }

</bundles_post_ra>
